<compile_context>
chip_gen: v7x
topology: tpu7x:2x2x1
jax: 0.10.0
libtpu: 0.0.40
codegen_flags: <defaults>
</compile_context>

<pallas_src>
import functools

import jax
import jax.numpy as jnp
from jax.experimental import pallas as pl
from jax.experimental.pallas import tpu as pltpu


def _round_up(x, m):
    return (x + m - 1) // m * m


def _scoring_kernel(p_ref, band_ref, prob_ref, dia_ref, acc_ref, *, slen):
    i = pl.program_id(0)

    p = p_ref[...]                                    # (1, T) — direct row-0 slice
    band = band_ref[...]                              # (T, T) — diagonal block of probs[1:]
    t = band.shape[0]

    # Extract the block diagonal: q[c] = band[c, c] (== probs[1 + col, col] globally).
    r = jax.lax.broadcasted_iota(jnp.int32, (t, t), 0)
    c = jax.lax.broadcasted_iota(jnp.int32, (t, t), 1)
    q = jnp.sum(jnp.where(r == c, band, 0.0), axis=0, keepdims=True)   # (1, T)

    # dia = calc(p, q) = q / p  (pre-log values, matching dia.tolist()).
    # Padded lanes hold p = q = 1.0 -> dia = 1.0.
    dia = q / p
    dia_ref[...] = dia

    @pl.when(i == 0)
    def _init():
        acc_ref[...] = jnp.zeros_like(acc_ref)
        prob_ref[...] = jnp.zeros_like(prob_ref)

    # Single log per lane (reuses the divide); padded lanes contribute log(1) == 0.
    acc_ref[...] += jnp.log(dia)

    @pl.when(i == pl.num_programs(0) - 1)
    def _finalize():
        prob_ref[...] = (jnp.sum(acc_ref[...], axis=1, keepdims=True)
                         / jnp.float32(slen))


def comparative_scoring(probs, return_all=False, *, tile=256):
    """probs: (N, M) float32 with N = slen + 1 and M >= slen."""
    N, M = probs.shape
    slen = N - 1
    assert M >= slen, "need at least slen columns"

    # Lane-aligned column tile (multiple of 128); capped at 256 so the (T, T)
    # band block (+ double buffering) stays tiny even under v7x's 64 MiB VMEM.
    T = min(_round_up(slen, 128), _round_up(tile, 128))
    num_tiles = pl.cdiv(slen, T)
    P = num_tiles * T

    # Only the data the kernel needs: row 0 and the shifted diagonal band.
    # Pad with 1.0 so out-of-range lanes are neutral for both dia and the log-sum.
    p_row = probs[0:1, :slen]                       # (1, slen)
    band = probs[1:1 + slen, :slen]                 # (slen, slen); band[c, c] == probs[1+c, c]
    pad = P - slen
    p_pad = jnp.pad(p_row, ((0, 0), (0, pad)), constant_values=1.0)        # (1, P)
    band_pad = jnp.pad(band, ((0, pad), (0, pad)), constant_values=1.0)    # (P, P)

    kernel = functools.partial(_scoring_kernel, slen=slen)

    prob, dia = pl.pallas_call(
        kernel,
        grid=(num_tiles,),
        in_specs=[
            pl.BlockSpec((1, T), lambda i: (0, i)),     # p: row-0 column tile
            pl.BlockSpec((T, T), lambda i: (i, i)),     # band: diagonal block only
        ],
        out_specs=(
            pl.BlockSpec((1, 1), lambda i: (0, 0)),     # resident scalar output
            pl.BlockSpec((1, T), lambda i: (0, i)),     # lane-dense dia tile
        ),
        out_shape=(
            jax.ShapeDtypeStruct((1, 1), jnp.float32),
            jax.ShapeDtypeStruct((1, P), jnp.float32),
        ),
        scratch_shapes=[pltpu.VMEM((1, T), jnp.float32)],   # persistent log-sum lanes
        compiler_params=pltpu.CompilerParams(
            dimension_semantics=("arbitrary",)),
    )(p_pad, band_pad)

    prob_scalar = prob[0, 0]
    if return_all:
        return prob_scalar, dia[0, :slen]
    return prob_scalar


def _reference(probs):
    """Pure-JAX reference mirroring the PyTorch forward (calc = q / p)."""
    N, _ = probs.shape
    slen = N - 1
    p = probs[0, :slen]
    q = probs[jnp.arange(1, slen + 1), jnp.arange(slen)]
    dia = q / p
    return jnp.mean(jnp.log(dia)), dia


if __name__ == "__main__":
    key = jax.random.PRNGKey(0)

    # Small case: slen = 8 substitutions, 16 probability columns (single tile).
    N, M = 9, 16
    probs = jax.random.uniform(key, (N, M), dtype=jnp.float32,
                               minval=0.1, maxval=1.0)
    prob, dia = comparative_scoring(probs, return_all=True)
    prob = jax.block_until_ready(prob)
    dia = jax.block_until_ready(dia)
    ref_prob, ref_dia = _reference(probs)
    assert jnp.allclose(prob, ref_prob, rtol=1e-5, atol=1e-5), (prob, ref_prob)
    assert jnp.allclose(dia, ref_dia, rtol=1e-5, atol=1e-5)

    # Larger case exercising the multi-tile accumulator path (slen = 300 -> 2 tiles).
    key2 = jax.random.PRNGKey(0)
    N2, M2 = 301, 320
    probs2 = jax.random.uniform(key2, (N2, M2), dtype=jnp.float32,
                                minval=0.1, maxval=1.0)
    prob2, dia2 = comparative_scoring(probs2, return_all=True)
    prob2 = jax.block_until_ready(prob2)
    dia2 = jax.block_until_ready(dia2)
    ref_prob2, ref_dia2 = _reference(probs2)
    assert jnp.allclose(prob2, ref_prob2, rtol=1e-5, atol=1e-5), (prob2, ref_prob2)
    assert jnp.allclose(dia2, ref_dia2, rtol=1e-5, atol=1e-5)

    print("KERNEL_OK")
</pallas_src>

<mosaic_0001>
module attributes {stable_mosaic.version = 11 : i64} {
  func.func @_scoring_kernel(%arg0: i32, %arg1: memref<1x128xf32, #tpu.memory_space<vmem>>, %arg2: memref<128x128xf32, #tpu.memory_space<vmem>>, %arg3: memref<1x1xf32, #tpu.memory_space<vmem>>, %arg4: memref<1x128xf32, #tpu.memory_space<vmem>>, %arg5: memref<1x128xf32, #tpu.memory_space<vmem>>) attributes {dimension_semantics = [#tpu.dimension_semantics<arbitrary>], iteration_bounds = array<i64: 1>, scalar_prefetch = 0 : i64, scratch_operands = 1 : i64, tpu.core_type = #tpu.core_type<tc>, window_params = [{transform_indices = @transform_0, window_bounds = array<i64: 1, 128>}, {transform_indices = @transform_1, window_bounds = array<i64: 128, 128>}, {pipeline_mode = #tpu.pipeline_mode<synchronous>, transform_indices = @transform_2, window_bounds = array<i64: 1, 1>}, {transform_indices = @transform_3, window_bounds = array<i64: 1, 128>}]} {
    %c0 = arith.constant 0 : index
    %c0_0 = arith.constant 0 : index
    %0 = vector.load %arg1[%c0, %c0_0] : memref<1x128xf32, #tpu.memory_space<vmem>>, vector<1x128xf32>
    %c0_1 = arith.constant 0 : index
    %c0_2 = arith.constant 0 : index
    %1 = vector.load %arg2[%c0_1, %c0_2] : memref<128x128xf32, #tpu.memory_space<vmem>>, vector<128x128xf32>
    %2 = tpu.iota {dimensions = array<i32: 0>} : vector<128x128xi32>
    %3 = tpu.iota {dimensions = array<i32: 1>} : vector<128x128xi32>
    %4 = arith.cmpi eq, %2, %3 : vector<128x128xi32>
    %cst = arith.constant 0.000000e+00 : f32
    %5 = vector.broadcast %cst : f32 to vector<128x128xf32>
    %6 = arith.select %4, %1, %5 : vector<128x128xi1>, vector<128x128xf32>
    %cst_3 = arith.constant dense<0.000000e+00> : vector<128xf32>
    %7 = vector.multi_reduction <add>, %6, %cst_3 [0] : vector<128x128xf32> to vector<128xf32>
    %8 = vector.shape_cast %7 : vector<128xf32> to vector<1x128xf32>
    %9 = arith.divf %8, %0 : vector<1x128xf32>
    %c0_4 = arith.constant 0 : index
    %c0_5 = arith.constant 0 : index
    %10 = vector.load %arg4[%c0_4, %c0_5] : memref<1x128xf32, #tpu.memory_space<vmem>>, vector<1x128xf32>
    tpu.vector_store %arg4[%c0_4, %c0_5], %9 {strides = array<i32>} : memref<1x128xf32, #tpu.memory_space<vmem>>, vector<1x128xf32>,
    %c0_i32 = arith.constant 0 : i32
    %11 = arith.cmpi eq, %arg0, %c0_i32 : i32
    %12 = arith.extui %11 : i1 to i32
    %c0_i32_6 = arith.constant 0 : i32
    %13 = arith.cmpi ne, %12, %c0_i32_6 : i32
    scf.if %13 {
      %cst_13 = arith.constant 0.000000e+00 : f32
      %21 = vector.broadcast %cst_13 : f32 to vector<1x128xf32>
      %c0_14 = arith.constant 0 : index
      %c0_15 = arith.constant 0 : index
      %22 = vector.load %arg5[%c0_14, %c0_15] : memref<1x128xf32, #tpu.memory_space<vmem>>, vector<1x128xf32>
      tpu.vector_store %arg5[%c0_14, %c0_15], %21 {strides = array<i32>} : memref<1x128xf32, #tpu.memory_space<vmem>>, vector<1x128xf32>,
      %cst_16 = arith.constant 0.000000e+00 : f32
      %23 = vector.broadcast %cst_16 : f32 to vector<1x1xf32>
      %c0_17 = arith.constant 0 : index
      %c0_18 = arith.constant 0 : index
      %24 = vector.load %arg3[%c0_17, %c0_18] : memref<1x1xf32, #tpu.memory_space<vmem>>, vector<1x1xf32>
      tpu.vector_store %arg3[%c0_17, %c0_18], %23 {strides = array<i32>} : memref<1x1xf32, #tpu.memory_space<vmem>>, vector<1x1xf32>,
    } else {
    }
    %c0_7 = arith.constant 0 : index
    %c0_8 = arith.constant 0 : index
    %14 = vector.load %arg5[%c0_7, %c0_8] : memref<1x128xf32, #tpu.memory_space<vmem>>, vector<1x128xf32>
    %15 = math.log %9 : vector<1x128xf32>
    %16 = arith.addf %14, %15 : vector<1x128xf32>
    %c0_9 = arith.constant 0 : index
    %c0_10 = arith.constant 0 : index
    %17 = vector.load %arg5[%c0_9, %c0_10] : memref<1x128xf32, #tpu.memory_space<vmem>>, vector<1x128xf32>
    tpu.vector_store %arg5[%c0_9, %c0_10], %16 {strides = array<i32>} : memref<1x128xf32, #tpu.memory_space<vmem>>, vector<1x128xf32>,
    %c0_i32_11 = arith.constant 0 : i32
    %18 = arith.cmpi eq, %arg0, %c0_i32_11 : i32
    %19 = arith.extui %18 : i1 to i32
    %c0_i32_12 = arith.constant 0 : i32
    %20 = arith.cmpi ne, %19, %c0_i32_12 : i32
    scf.if %20 {
      %c0_13 = arith.constant 0 : index
      %c0_14 = arith.constant 0 : index
      %21 = vector.load %arg5[%c0_13, %c0_14] : memref<1x128xf32, #tpu.memory_space<vmem>>, vector<1x128xf32>
      %cst_15 = arith.constant dense<0.000000e+00> : vector<1xf32>
      %22 = vector.multi_reduction <add>, %21, %cst_15 [1] : vector<1x128xf32> to vector<1xf32>
      %23 = vector.shape_cast %22 : vector<1xf32> to vector<1x1xf32>
      %cst_16 = arith.constant 8.000000e+00 : f32
      %24 = vector.broadcast %cst_16 : f32 to vector<1x1xf32>
      %25 = arith.divf %23, %24 : vector<1x1xf32>
      %c0_17 = arith.constant 0 : index
      %c0_18 = arith.constant 0 : index
      %26 = vector.load %arg3[%c0_17, %c0_18] : memref<1x1xf32, #tpu.memory_space<vmem>>, vector<1x1xf32>
      tpu.vector_store %arg3[%c0_17, %c0_18], %25 {strides = array<i32>} : memref<1x1xf32, #tpu.memory_space<vmem>>, vector<1x1xf32>,
    } else {
    }
    return
  }
  func.func @transform_0(%arg0: i32) -> (i32, i32) {
    %c0_i32 = arith.constant 0 : i32
    %c0_i32_0 = arith.constant 0 : i32
    return %c0_i32, %arg0 : i32, i32
  }
  func.func @transform_1(%arg0: i32) -> (i32, i32) {
    %c0_i32 = arith.constant 0 : i32
    return %arg0, %arg0 : i32, i32
  }
  func.func @transform_2(%arg0: i32) -> (i32, i32) {
    %c0_i32 = arith.constant 0 : i32
    %c0_i32_0 = arith.constant 0 : i32
    %c0_i32_1 = arith.constant 0 : i32
    return %c0_i32, %c0_i32_0 : i32, i32
  }
  func.func @transform_3(%arg0: i32) -> (i32, i32) {
    %c0_i32 = arith.constant 0 : i32
    %c0_i32_0 = arith.constant 0 : i32
    return %c0_i32, %arg0 : i32, i32
  }
}

</mosaic_0001>

<bundles_post_ra>
// kernel: tpu_custom_call.1
= control target key start
LH: loop header
LB: loop body
LE: loop exit
PB: predicated region body
PF: predicated region fallthrough
CT: control target
= control target key end

     0   :  { %9 = vsyncpa [#allocation4], 0  ;;  %s416_s0 = inlined_call_operand.hbm [shape: f32[1,128], index: 0, kind: input, shape index: {}]   ;;  %s417_s1 = inlined_call_operand.hbm [shape: f32[128,128], index: 1, kind: input, shape index: {}]   ;;  %s418_s2 = inlined_call_operand.hbm [shape: f32[1,1], index: 2, kind: output, shape index: {0}]   ;;  %s419_s3 = inlined_call_operand.hbm [shape: f32[1,128], index: 3, kind: output, shape index: {1}]  }
   0x1   :  { %10 = vsyncpa [#allocation7], 0 }
   0x2   :  { %11 = vsyncpa [#allocation5], 0 }
   0x3   :  { %12 = vsyncpa [#allocation10], 0  ;;  %s294_s12 = smov [#allocation3]   ;;  %s295_s14 = smov [#allocation6]  }
   0x4   :  { %s19_s13 = sshll.u32 %s294_s12, 4  ;;  %s28_s15 = sshll.u32 %s295_s14, 4  ;;  %s20_s13 = int_to_ptr.vmem [resolvable:$true] %s19_s13  ;;  %s321_s15 = int_to_ptr.vmem [resolvable:$true] %s28_s15 }
   0x5   :  { %s198_s18 = scalar_lea.hbm %s416_s0, 16 }
   0x6   :  { %p199_p0 = scmp.ne.s32.totalorder %s416_s0, %s198_s18  ;;  %p202_p1 = scmp.lt.u32.totalorder %s198_s18, %s416_s0 }
   0x8   :  { %p204_p2 = pnand %p202_p1, %p199_p0 }
   0xa   :  { %207 = shalt.err (!%p204_p2)
}
   0xb   :  { %s208_s23 = scalar_lea.vmem %s20_s13, 16  ;;  %s212_s24 = scalar_lea.vmem %s20_s13, 32 }
   0xc   :  { %p209_p3 = scmp.ne.s32.totalorder %s20_s13, %s208_s23  ;;  %p213_p4 = scmp.lt.s32.totalorder %s20_s13, %s20_s13 }
   0xd   :  { %p214_p5 = scmp.lt.s32.totalorder %s212_s24, %s208_s23 }
   0xf   :  { %p215_p6 = por %p214_p5, %p213_p4 }
  0x11   :  { %p216_p7 = pnand %p215_p6, %p209_p3 }
  0x13   :  { %219 = shalt.err (!%p216_p7)
}
  0x14   :  { %22 = dma.hbm_to_vmem [thread:$0]  %s416_s0, 16, %s20_s13, [#allocation4]  }
  0x15   :  { %s220_s29 = scalar_lea.hbm %s417_s1, 2048 }
  0x16   :  { %p221_p8 = scmp.ne.s32.totalorder %s417_s1, %s220_s29  ;;  %p224_p9 = scmp.lt.u32.totalorder %s220_s29, %s417_s1 }
  0x18   :  { %p226_p10 = pnand %p224_p9, %p221_p8 }
  0x1a   :  { %229 = shalt.err (!%p226_p10)
}
  0x1b   :  { %s230_s7 = scalar_lea.vmem %s321_s15, 2048  ;;  %p235_p12 = scmp.lt.s32.totalorder %s321_s15, %s321_s15 }
  0x1c   :  { %p231_p11 = scmp.ne.s32.totalorder %s321_s15, %s230_s7  ;;  %p236_p13 = scmp.lt.s32.totalorder %s230_s7, %s230_s7 }
  0x1e   :  { %p237_p0 = por %p236_p13, %p235_p12 }
  0x20   :  { %p238_p1 = pnand %p237_p0, %p231_p11 }
  0x22   :  { %241 = shalt.err (!%p238_p1)
}
  0x23   :  { %s296_s0 = smov 128   ;;  %s297_s8 = smov 8  }
  0x24   :  { %34 = dma.hbm_to_vmem [thread:$0]  %s417_s1, 2048, %s321_s15, [#allocation7], %s296_s0, %s296_s0, %s297_s8  }
  0x25   :  { %286 = dma.done.wait [#allocation4], 16  }
  0x26   :  { %287 = vsyncadd [#allocation4], 4294967280 }
  0x27   :  { %288 = dma.done.wait [#allocation7], 2048  }
  0x28   :  { %289 = vsyncadd [#allocation7], 4294965248  ;;  %v58_v0 = vlaneseq  ;;  %v298_v1 = vmov 0.0   ;;  %v42_v6 = vld [vmem:[#allocation6] sm:$0xff]  ;;  %v43_v7 = vld [vmem:[#allocation6 + $0x8] sm:$0xff]  ;;  %s299_s1 = smov [#allocation9]  }
  0x29   :  { %137 = vst [vmem:[#allocation2] sm:$0x1] %v298_v1  ;;  %v44_v9 = vld [vmem:[#allocation6 + $0x10] sm:$0xff]  ;;  %v45_v13 = vld [vmem:[#allocation6 + $0x18] sm:$0xff]  ;;  %v46_v16 = vld [vmem:[#allocation6 + $0x20] sm:$0xff]  ;;  %s173_s11 = sshll.u32 %s299_s1, 4  ;;  %s174_s11 = int_to_ptr.vmem [resolvable:$true] %s173_s11 }
  0x2a   :  { %v353_v2 = vshrl.u32 %v58_v0, 7  ;;  %v356_v4 = vand.u32 127, %v58_v0  ;;  %v47_v20 = vld [vmem:[#allocation6 + $0x28] sm:$0xff]  ;;  %v48_v24 = vld [vmem:[#allocation6 + $0x30] sm:$0xff]  ;;  %v49_v28 = vld [vmem:[#allocation6 + $0x38] sm:$0xff]  ;;  %s242_s12 = scalar_lea.vmem %s174_s11, 16  ;;  %p247_p3 = scmp.lt.s32.totalorder %s174_s11, %s174_s11 }
  0x2b   :  { %v50_v32 = vld [vmem:[#allocation6 + $0x40] sm:$0xff]  ;;  %v51_v36 = vld [vmem:[#allocation6 + $0x48] sm:$0xff]  ;;  %v52_v40 = vld [vmem:[#allocation6 + $0x50] sm:$0xff]  ;;  %p243_p2 = scmp.ne.s32.totalorder %s174_s11, %s242_s12  ;;  %s246_s13 = scalar_lea.vmem %s174_s11, 32 }
  0x2c   :  { %v60_v3 = vadd.s32 8, %v353_v2  ;;  %v61_v5 = vadd.s32 16, %v353_v2  ;;  %v62_v8 = vadd.s32 24, %v353_v2  ;;  %vm77_vm0 = vcmp.eq.s32.totalorder %v353_v2, %v356_v4  ;;  %v53_v44 = vld [vmem:[#allocation6 + $0x58] sm:$0xff]  ;;  %v54_v48 = vld [vmem:[#allocation6 + $0x60] sm:$0xff]  ;;  %v55_v52 = vld [vmem:[#allocation6 + $0x68] sm:$0xff]  ;;  %p248_p4 = scmp.lt.s32.totalorder %s246_s13, %s242_s12 }
  0x2d   :  { %v63_v10 = vadd.s32 32, %v353_v2  ;;  %v93_v11 = vsel %vm77_vm0, %v42_v6, 0.0  ;;  %v64_v14 = vadd.s32 40, %v353_v2  ;;  %v65_v17 = vadd.s32 48, %v353_v2  ;;  %v56_v56 = vld [vmem:[#allocation6 + $0x70] sm:$0xff]  ;;  %v57_v59 = vld [vmem:[#allocation6 + $0x78] sm:$0xff] }
  0x2e   :  { %vm78_vm1 = vcmp.eq.s32.totalorder %v60_v3, %v356_v4  ;;  %vm79_vm2 = vcmp.eq.s32.totalorder %v61_v5, %v356_v4  ;;  %vm80_vm3 = vcmp.eq.s32.totalorder %v62_v8, %v356_v4  ;;  %v66_v21 = vadd.s32 56, %v353_v2  ;;  %v41_v0 = vld [vmem:[#allocation3] sm:$0x1]  ;;  %p249_p5 = por %p248_p4, %p247_p3 }
  0x2f   :  { %v94_v12 = vsel %vm78_vm1, %v43_v7, 0.0  ;;  %v95_v15 = vsel %vm79_vm2, %v44_v9, 0.0  ;;  %vm81_vm4 = vcmp.eq.s32.totalorder %v63_v10, %v356_v4  ;;  %v96_v19 = vsel %vm80_vm3, %v45_v13, 0.0 }
  0x30   :  { %v109_v18 = vadd.f32 %v94_v12, %v93_v11  ;;  %vm82_vm5 = vcmp.eq.s32.totalorder %v64_v14, %v356_v4  ;;  %v97_v23 = vsel %vm81_vm4, %v46_v16, 0.0  ;;  %v67_v25 = vadd.s32 64, %v353_v2  ;;  %p250_p6 = pnand %p249_p5, %p243_p2 }
  0x31   :  { %vm83_vm6 = vcmp.eq.s32.totalorder %v65_v17, %v356_v4  ;;  %v98_v27 = vsel %vm82_vm5, %v47_v20, 0.0  ;;  %v68_v29 = vadd.s32 72, %v353_v2  ;;  %vm84_vm7 = vcmp.eq.s32.totalorder %v66_v21, %v356_v4 }
  0x32   :  { %v110_v22 = vadd.f32 %v109_v18, %v95_v15  ;;  %v99_v31 = vsel %vm83_vm6, %v48_v24, 0.0  ;;  %v69_v33 = vadd.s32 80, %v353_v2  ;;  %vm85_vm8 = vcmp.eq.s32.totalorder %v67_v25, %v356_v4 }
  0x33   :  { %v100_v35 = vsel %vm84_vm7, %v49_v28, 0.0  ;;  %v70_v37 = vadd.s32 88, %v353_v2  ;;  %vm86_vm9 = vcmp.eq.s32.totalorder %v68_v29, %v356_v4  ;;  %v101_v39 = vsel %vm85_vm8, %v50_v32, 0.0 }
  0x34   :  { %v111_v26 = vadd.f32 %v110_v22, %v96_v19  ;;  %v71_v41 = vadd.s32 96, %v353_v2  ;;  %vm87_vm10 = vcmp.eq.s32.totalorder %v69_v33, %v356_v4  ;;  %v102_v43 = vsel %vm86_vm9, %v51_v36, 0.0 }
  0x35   :  { %v72_v45 = vadd.s32 104, %v353_v2  ;;  %vm88_vm11 = vcmp.eq.s32.totalorder %v70_v37, %v356_v4  ;;  %v103_v47 = vsel %vm87_vm10, %v52_v40, 0.0  ;;  %v73_v49 = vadd.s32 112, %v353_v2 }
  0x36   :  { %v112_v30 = vadd.f32 %v111_v26, %v97_v23  ;;  %vm89_vm12 = vcmp.eq.s32.totalorder %v71_v41, %v356_v4  ;;  %v104_v51 = vsel %vm88_vm11, %v53_v44, 0.0  ;;  %v74_v53 = vadd.s32 120, %v353_v2 }
  0x37   :  { %vm90_vm13 = vcmp.eq.s32.totalorder %v72_v45, %v356_v4  ;;  %v105_v55 = vsel %vm89_vm12, %v54_v48, 0.0  ;;  %vm91_vm14 = vcmp.eq.s32.totalorder %v73_v49, %v356_v4  ;;  %194 = vrcp.f32 %v41_v0 }
  0x38   :  { %v113_v34 = vadd.f32 %v112_v30, %v98_v27  ;;  %v106_v58 = vsel %vm90_vm13, %v55_v52, 0.0  ;;  %vm92_vm15 = vcmp.eq.s32.totalorder %v74_v53, %v356_v4  ;;  %v107_v61 = vsel %vm91_vm14, %v56_v56, 0.0  ;;  %v140_v4 = vld [vmem:[#allocation2] sm:$0x1] }
  0x39   :  { %v108_v63 = vsel %vm92_vm15, %v57_v59, 0.0  ;;  %vm149_vm0 = vcmask 1040384   ;;  %vm138_vm1 = vcmask 0  }
  0x3a   :  { %v114_v38 = vadd.f32 %v113_v34, %v99_v31  ;;  %139 = vst.msk [vmem:[#allocation8] sm:$0x1] %vm138_vm1, %v298_v1 }
  0x3c   :  { %v115_v42 = vadd.f32 %v114_v38, %v100_v35 }
  0x3e   :  { %v116_v46 = vadd.f32 %v115_v42, %v101_v39 }
  0x40   :  { %v117_v50 = vadd.f32 %v116_v46, %v102_v43 }
  0x41   :  { %v195_v10 = vpop.eup %194 }
  0x42   :  { %v118_v54 = vadd.f32 %v117_v50, %v103_v47 }
  0x44   :  { %v119_v57 = vadd.f32 %v118_v54, %v104_v51 }
  0x46   :  { %v120_v60 = vadd.f32 %v119_v57, %v105_v55 }
  0x48   :  { %v121_v62 = vadd.f32 %v120_v60, %v106_v58 }
  0x4a   :  { %v122_v3 = vadd.f32 %v121_v62, %v107_v61 }
  0x4c   :  { %v123_v5 = vadd.f32 %v122_v3, %v108_v63 }
  0x4e   :  { %v124_v2 = vrot.slane %v123_v5, 4 }
  0x50   :  { %v125_v6 = vadd.f32 %v124_v2, %v123_v5 }
  0x52   :  { %v126_v7 = vrot.slane %v125_v6, 2 }
  0x54   :  { %v127_v8 = vadd.f32 %v126_v7, %v125_v6 }
  0x56   :  { %v128_v9 = vrot.slane %v127_v8, 1 }
  0x58   :  { %v129_v11 = vadd.f32 %v128_v9, %v127_v8 }
  0x5a   :  { %v131_v12 = vmul.f32 %v195_v10, %v129_v11 }
  0x5c   :  { %196 = vlog2.f32 %v131_v12  ;;  %132 = vst [vmem:[#allocation9] sm:$0x1] %v131_v12 }
  0x66   :  { %v197_v13 = vpop.eup %196 }
  0x67   :  { %v142_v14 = vmul.f32 0.6931472, %v197_v13 }
  0x69   :  { %v143_v15 = vadd.f32 %v142_v14, %v140_v4 }
  0x6b   :  { %144 = vst [vmem:[#allocation2] sm:$0x1] %v143_v15 }
  0x72   :  { %v148_v16 = vld [vmem:[#allocation2] sm:$0x1] }
  0x73   :  { %v150_v17 = vsel %vm149_vm0, %v148_v16, 0.0 }
  0x74   :  { %151 = vadd.xlane.f32.xlu0 %v150_v17 }
  0x75   :  { %253 = shalt.err (!%p250_p6)
}
  0x76   :  { %s254_s16 = scalar_lea.hbm %s419_s3, 16 }
  0x77   :  { %p255_p7 = scmp.ne.s32.totalorder %s419_s3, %s254_s16  ;;  %p258_p8 = scmp.lt.u32.totalorder %s254_s16, %s419_s3 }
  0x79   :  { %p260_p9 = pnand %p258_p8, %p255_p7 }
  0x7b   :  { %263 = shalt.err (!%p260_p9)
}
  0x7c   :  { %176 = dma.vmem_to_hbm [thread:$0]  %s174_s11, 16, %s419_s3, [#allocation10]  }
  0x7d   :  { %s300_s23 = smov [#allocation8]  }
  0x7e   :  { %s163_s24 = sshll.u32 %s300_s23, 4  ;;  %s164_s24 = int_to_ptr.vmem [resolvable:$true] %s163_s24 }
  0x7f   :  { %s264_s25 = scalar_lea.vmem %s164_s24, 16  ;;  %s268_s26 = scalar_lea.vmem %s164_s24, 32 }
  0x80   :  { %p265_p10 = scmp.ne.s32.totalorder %s164_s24, %s264_s25  ;;  %p269_p11 = scmp.lt.s32.totalorder %s164_s24, %s164_s24 }
  0x81   :  { %p270_p12 = scmp.lt.s32.totalorder %s268_s26, %s264_s25 }
  0x83   :  { %p271_p13 = por %p270_p12, %p269_p11 }
  0x85   :  { %p272_p0 = pnand %p271_p13, %p265_p10 }
 0x101   :  { %v152_v1 = vpop.xlane.xlu0 %151 }
 0x102   :  { %v154_v18 = vmul.f32 0.125, %v152_v1 }
 0x104   :  { %156 = vst.msk [vmem:[#allocation8] sm:$0x1] %vm138_vm1, %v154_v18 }
 0x105   :  { %275 = shalt.err (!%p272_p0)
}
 0x106   :  { %s276_s29 = scalar_lea.hbm %s418_s2, 16 }
 0x107   :  { %p277_p1 = scmp.ne.s32.totalorder %s418_s2, %s276_s29  ;;  %p280_p2 = scmp.lt.u32.totalorder %s276_s29, %s418_s2 }
 0x109   :  { %p282_p3 = pnand %p280_p2, %p277_p1 }
 0x10b   :  { %285 = shalt.err (!%p282_p3)
}
 0x10c   :  { %166 = dma.vmem_to_hbm [thread:$0]  %s164_s24, 16, %s418_s2, [#allocation5]  }
 0x10d   :  { %290 = dma.done.wait [#allocation5], 16  }
 0x10e   :  { %291 = vsyncadd [#allocation5], 4294967280 }
 0x10f   :  { %292 = dma.done.wait [#allocation10], 16  }
 0x110   :  { %293 = vsyncadd [#allocation10], 4294967280 }
 0x111   :  { %183 = vsyncpa [#allocation4], 1 }
 0x112   :  { %184 = vsyncpa [#allocation7], 1 }
 0x113   :  { %185 = vsyncpa [#allocation5], 1 }
 0x114   :  { %186 = vsyncpa [#allocation10], 1 }

</bundles_post_ra>
